<compile_context>
chip_gen: v5e
topology: v5e:2x2
jax: 0.10.0
libtpu: 0.0.40
codegen_flags: <defaults>
</compile_context>

<pallas_src>
import jax
import jax.numpy as jnp
from jax.experimental import pallas as pl
from jax.experimental.pallas import tpu as pltpu


def _round_up(x, m):
    return ((x + m - 1) // m) * m


def _make_kernel(cdt, precision):
    def kernel(s_ref, ns_ref, t_ref,
               w1c_ref, w1t_ref, b1_ref,
               w2_ref, b2_ref, w3_ref, b3_ref, o_ref):
        # ---- Layer 1: fused concat([state, next_state]) -> Linear -> ReLU ----
        x = jnp.concatenate([s_ref[...], ns_ref[...]], axis=1).astype(cdt)
        h = jnp.dot(x, w1c_ref[...], preferred_element_type=jnp.float32,
                    precision=precision)
        h += t_ref[...] * w1t_ref[...]          # rank-1 terminal term (VPU, f32)
        h = jnp.maximum(h + b1_ref[...], 0.0)

        # ---- Layer 2: Linear -> ReLU -----------------------------------------
        h = jnp.dot(h.astype(cdt), w2_ref[...], preferred_element_type=jnp.float32,
                    precision=precision)
        h = jnp.maximum(h + b2_ref[...], 0.0)

        # ---- Output layer: Linear -> Tanh (unpadded (TB, A) store) ------------
        h = jnp.dot(h.astype(cdt), w3_ref[...], preferred_element_type=jnp.float32,
                    precision=precision)
        o_ref[...] = jnp.tanh(h + b3_ref[...]).astype(o_ref.dtype)
    return kernel


def pack_params(params, matmul_dtype=jnp.bfloat16):
    """One-time weight preprocessing (hoisted out of the per-call wrapper)."""
    w1, b1, w2, b2, w3, b3 = params
    cdt = jnp.dtype(matmul_dtype)
    two_s = w1.shape[0] - 1                            # 2 * state_dim
    w1c = w1[:two_s].astype(cdt)                       # (2S, H): single layer-1 matmul
    w1t = w1[two_s:two_s + 1].astype(jnp.float32)      # (1, H): terminal row, f32 VPU term
    return (w1c, w1t, b1.astype(jnp.float32),
            w2.astype(cdt), b2.astype(jnp.float32),
            w3.astype(cdt), b3.astype(jnp.float32))


def inverse_dynamics_forward(state, next_state, terminal, packed_params, *,
                             block_b=1024, matmul_dtype=jnp.bfloat16):
    """MLP forward for InverseDynamicsFunction, batch-tiled Pallas kernel."""
    w1c, w1t, b1, w2c, b2, w3c, b3 = packed_params
    B, S = state.shape
    H = w1c.shape[1]
    A = w3c.shape[1]
    cdt = jnp.dtype(matmul_dtype)
    precision = jax.lax.Precision.HIGHEST if cdt == jnp.float32 else None

    # (B,) -> (B, 1) so the terminal term broadcasts against (1, H). Metadata-only.
    t2d = terminal.astype(jnp.float32).reshape(B, 1)

    # Batch tile: multiple of 8; keep >= 2 grid steps when B allows (v7x megacore).
    # Ragged last block is masked by Pallas (rows are independent, so padding
    # garbage only ever lands in discarded output rows).
    TB = min(block_b, _round_up(pl.cdiv(B, 2), 8))
    if TB >= B:
        TB = B
    grid = (pl.cdiv(B, TB),)

    batch_spec = lambda f: pl.BlockSpec((TB, f), lambda i: (i, 0))
    resident = lambda arr: pl.BlockSpec(arr.shape, lambda i: (0, 0))

    flops = 2 * B * (2 * S * H + H * H + H * A) + 2 * B * H
    bytes_accessed = (
        (state.size + next_state.size) * state.dtype.itemsize
        + t2d.size * 4
        + (w1c.size + w2c.size + w3c.size) * cdt.itemsize
        + (w1t.size + b1.size + b2.size + b3.size) * 4
        + B * A * 4)
    cost = pl.CostEstimate(flops=flops, transcendentals=B * A,
                           bytes_accessed=bytes_accessed)

    return pl.pallas_call(
        _make_kernel(cdt, precision),
        out_shape=jax.ShapeDtypeStruct((B, A), jnp.float32),
        grid=grid,
        in_specs=[
            batch_spec(S), batch_spec(S), batch_spec(1),
            resident(w1c), resident(w1t), resident(b1),
            resident(w2c), resident(b2),
            resident(w3c), resident(b3),
        ],
        out_specs=pl.BlockSpec((TB, A), lambda i: (i, 0)),
        compiler_params=pltpu.CompilerParams(
            dimension_semantics=("parallel",)),
        cost_estimate=cost,
    )(state, next_state, t2d, w1c, w1t, b1, w2c, b2, w3c, b3)


def init_params(key, state_dim, action_dim, hidden_dim=256, n_hidden=2):
    """Deterministic PyTorch-Linear-style init (uniform +/- 1/sqrt(fan_in))."""
    assert n_hidden == 2, "kernel is written for n_hidden=2"
    dims = [state_dim * 2 + 1, hidden_dim, hidden_dim, action_dim]
    params = []
    for i in range(len(dims) - 1):
        fan_in, fan_out = dims[i], dims[i + 1]
        key, kw, kb = jax.random.split(key, 3)
        bound = 1.0 / jnp.sqrt(jnp.float32(fan_in))
        w = jax.random.uniform(kw, (fan_in, fan_out), jnp.float32, -bound, bound)
        b = jax.random.uniform(kb, (1, fan_out), jnp.float32, -bound, bound)
        params += [w, b]
    return tuple(params)


def reference_forward(state, next_state, terminal, params):
    """Pure-JAX reference for correctness check."""
    w1, b1, w2, b2, w3, b3 = params
    x = jnp.concatenate([state, next_state, terminal[:, None]], axis=1)
    h = jnp.maximum(x @ w1 + b1, 0.0)
    h = jnp.maximum(h @ w2 + b2, 0.0)
    return jnp.tanh(h @ w3 + b3)


if __name__ == "__main__":
    # Small shapes consistent with the module's forward.
    B, state_dim, action_dim, hidden_dim = 8, 8, 4, 32

    key = jax.random.PRNGKey(0)
    kp, ks, kn, kt = jax.random.split(key, 4)
    params = init_params(kp, state_dim, action_dim, hidden_dim=hidden_dim, n_hidden=2)

    state = jax.random.normal(ks, (B, state_dim), jnp.float32)
    next_state = jax.random.normal(kn, (B, state_dim), jnp.float32)
    terminal = (jax.random.uniform(kt, (B,)) > 0.8).astype(jnp.float32)

    ref = reference_forward(state, next_state, terminal, params)

    # Exact path: f32 matmuls with Precision.HIGHEST -> tight tolerance.
    packed_f32 = pack_params(params, matmul_dtype=jnp.float32)
    out_f32 = inverse_dynamics_forward(state, next_state, terminal, packed_f32,
                                       matmul_dtype=jnp.float32)
    out_f32 = jax.block_until_ready(out_f32)
    assert out_f32.shape == (B, action_dim)
    assert jnp.allclose(out_f32, ref, atol=1e-5, rtol=1e-5)

    # Fast path: bf16 matmuls with f32 accumulation -> loosened tolerance.
    packed_bf16 = pack_params(params, matmul_dtype=jnp.bfloat16)
    out_bf16 = jax.block_until_ready(
        inverse_dynamics_forward(state, next_state, terminal, packed_bf16,
                                 matmul_dtype=jnp.bfloat16))
    assert out_bf16.shape == (B, action_dim)
    assert jnp.allclose(out_bf16, ref, atol=2e-2, rtol=2e-2)

    # Ragged batch: exercises the cdiv grid (>= 2 steps) + masked last block.
    B2 = 300
    k2 = jax.random.PRNGKey(1)
    k2s, k2n, k2t = jax.random.split(k2, 3)
    state2 = jax.random.normal(k2s, (B2, state_dim), jnp.float32)
    next_state2 = jax.random.normal(k2n, (B2, state_dim), jnp.float32)
    terminal2 = (jax.random.uniform(k2t, (B2,)) > 0.8).astype(jnp.float32)
    ref2 = reference_forward(state2, next_state2, terminal2, params)
    out2 = jax.block_until_ready(
        inverse_dynamics_forward(state2, next_state2, terminal2, packed_bf16,
                                 block_b=128, matmul_dtype=jnp.bfloat16))
    assert out2.shape == (B2, action_dim)
    assert jnp.allclose(out2, ref2, atol=2e-2, rtol=2e-2)

    print("KERNEL_OK")
</pallas_src>

<mosaic_0001>
module attributes {stable_mosaic.version = 11 : i64} {
  func.func @kernel(%arg0: i32, %arg1: memref<8x8xf32, #tpu.memory_space<vmem>>, %arg2: memref<8x8xf32, #tpu.memory_space<vmem>>, %arg3: memref<8x1xf32, #tpu.memory_space<vmem>>, %arg4: memref<16x32xf32, #tpu.memory_space<vmem>>, %arg5: memref<1x32xf32, #tpu.memory_space<vmem>>, %arg6: memref<1x32xf32, #tpu.memory_space<vmem>>, %arg7: memref<32x32xf32, #tpu.memory_space<vmem>>, %arg8: memref<1x32xf32, #tpu.memory_space<vmem>>, %arg9: memref<32x4xf32, #tpu.memory_space<vmem>>, %arg10: memref<1x4xf32, #tpu.memory_space<vmem>>, %arg11: memref<8x4xf32, #tpu.memory_space<vmem>>) attributes {dimension_semantics = [#tpu.dimension_semantics<parallel>], iteration_bounds = array<i64: 1>, scalar_prefetch = 0 : i64, scratch_operands = 0 : i64, tpu.core_type = #tpu.core_type<tc>, window_params = [{transform_indices = @transform_0, window_bounds = array<i64: 8, 8>}, {transform_indices = @transform_1, window_bounds = array<i64: 8, 8>}, {transform_indices = @transform_2, window_bounds = array<i64: 8, 1>}, {pipeline_mode = #tpu.pipeline_mode<synchronous>, transform_indices = @transform_3, window_bounds = array<i64: 16, 32>}, {pipeline_mode = #tpu.pipeline_mode<synchronous>, transform_indices = @transform_4, window_bounds = array<i64: 1, 32>}, {pipeline_mode = #tpu.pipeline_mode<synchronous>, transform_indices = @transform_5, window_bounds = array<i64: 1, 32>}, {pipeline_mode = #tpu.pipeline_mode<synchronous>, transform_indices = @transform_6, window_bounds = array<i64: 32, 32>}, {pipeline_mode = #tpu.pipeline_mode<synchronous>, transform_indices = @transform_7, window_bounds = array<i64: 1, 32>}, {pipeline_mode = #tpu.pipeline_mode<synchronous>, transform_indices = @transform_8, window_bounds = array<i64: 32, 4>}, {pipeline_mode = #tpu.pipeline_mode<synchronous>, transform_indices = @transform_9, window_bounds = array<i64: 1, 4>}, {transform_indices = @transform_10, window_bounds = array<i64: 8, 4>}]} {
    %c0 = arith.constant 0 : index
    %c0_0 = arith.constant 0 : index
    %0 = vector.load %arg1[%c0, %c0_0] : memref<8x8xf32, #tpu.memory_space<vmem>>, vector<8x8xf32>
    %c0_1 = arith.constant 0 : index
    %c0_2 = arith.constant 0 : index
    %1 = vector.load %arg2[%c0_1, %c0_2] : memref<8x8xf32, #tpu.memory_space<vmem>>, vector<8x8xf32>
    %2 = tpu.concatenate %0, %1 in 1 : vector<8x8xf32>, vector<8x8xf32> -> vector<8x16xf32>
    %c0_3 = arith.constant 0 : index
    %c0_4 = arith.constant 0 : index
    %3 = vector.load %arg4[%c0_3, %c0_4] : memref<16x32xf32, #tpu.memory_space<vmem>>, vector<16x32xf32>
    %cst = arith.constant dense<0.000000e+00> : vector<8x32xf32>
    %4 = tpu.matmul %2, %3, %cst {dimension_numbers = #tpu.dot_dimension_numbers<[1], [0], [0], [1], [0, 0, 1, 1], [], []>, precision = #tpu.contract_precision<fp32>} : vector<8x16xf32>, vector<16x32xf32>, vector<8x32xf32> -> vector<8x32xf32>
    %c0_5 = arith.constant 0 : index
    %c0_6 = arith.constant 0 : index
    %5 = vector.load %arg3[%c0_5, %c0_6] : memref<8x1xf32, #tpu.memory_space<vmem>>, vector<8x1xf32>
    %c0_7 = arith.constant 0 : index
    %c0_8 = arith.constant 0 : index
    %6 = vector.load %arg5[%c0_7, %c0_8] : memref<1x32xf32, #tpu.memory_space<vmem>>, vector<1x32xf32>
    %7 = vector.broadcast %5 : vector<8x1xf32> to vector<8x32xf32>
    %8 = vector.broadcast %6 : vector<1x32xf32> to vector<8x32xf32>
    %9 = arith.mulf %7, %8 : vector<8x32xf32>
    %10 = arith.addf %4, %9 : vector<8x32xf32>
    %c0_9 = arith.constant 0 : index
    %c0_10 = arith.constant 0 : index
    %11 = vector.load %arg6[%c0_9, %c0_10] : memref<1x32xf32, #tpu.memory_space<vmem>>, vector<1x32xf32>
    %12 = vector.broadcast %11 : vector<1x32xf32> to vector<8x32xf32>
    %13 = arith.addf %10, %12 : vector<8x32xf32>
    %cst_11 = arith.constant 0.000000e+00 : f32
    %14 = vector.broadcast %cst_11 : f32 to vector<8x32xf32>
    %15 = arith.maximumf %13, %14 : vector<8x32xf32>
    %c0_12 = arith.constant 0 : index
    %c0_13 = arith.constant 0 : index
    %16 = vector.load %arg7[%c0_12, %c0_13] : memref<32x32xf32, #tpu.memory_space<vmem>>, vector<32x32xf32>
    %cst_14 = arith.constant dense<0.000000e+00> : vector<8x32xf32>
    %17 = tpu.matmul %15, %16, %cst_14 {dimension_numbers = #tpu.dot_dimension_numbers<[1], [0], [0], [1], [0, 0, 1, 1], [], []>, precision = #tpu.contract_precision<fp32>} : vector<8x32xf32>, vector<32x32xf32>, vector<8x32xf32> -> vector<8x32xf32>
    %c0_15 = arith.constant 0 : index
    %c0_16 = arith.constant 0 : index
    %18 = vector.load %arg8[%c0_15, %c0_16] : memref<1x32xf32, #tpu.memory_space<vmem>>, vector<1x32xf32>
    %19 = vector.broadcast %18 : vector<1x32xf32> to vector<8x32xf32>
    %20 = arith.addf %17, %19 : vector<8x32xf32>
    %cst_17 = arith.constant 0.000000e+00 : f32
    %21 = vector.broadcast %cst_17 : f32 to vector<8x32xf32>
    %22 = arith.maximumf %20, %21 : vector<8x32xf32>
    %c0_18 = arith.constant 0 : index
    %c0_19 = arith.constant 0 : index
    %23 = vector.load %arg9[%c0_18, %c0_19] : memref<32x4xf32, #tpu.memory_space<vmem>>, vector<32x4xf32>
    %cst_20 = arith.constant dense<0.000000e+00> : vector<8x4xf32>
    %24 = tpu.matmul %22, %23, %cst_20 {dimension_numbers = #tpu.dot_dimension_numbers<[1], [0], [0], [1], [0, 0, 1, 1], [], []>, precision = #tpu.contract_precision<fp32>} : vector<8x32xf32>, vector<32x4xf32>, vector<8x4xf32> -> vector<8x4xf32>
    %c0_21 = arith.constant 0 : index
    %c0_22 = arith.constant 0 : index
    %25 = vector.load %arg10[%c0_21, %c0_22] : memref<1x4xf32, #tpu.memory_space<vmem>>, vector<1x4xf32>
    %26 = vector.broadcast %25 : vector<1x4xf32> to vector<8x4xf32>
    %27 = arith.addf %24, %26 : vector<8x4xf32>
    %28 = math.tanh %27 : vector<8x4xf32>
    %c0_23 = arith.constant 0 : index
    %c0_24 = arith.constant 0 : index
    %29 = vector.load %arg11[%c0_23, %c0_24] : memref<8x4xf32, #tpu.memory_space<vmem>>, vector<8x4xf32>
    tpu.vector_store %arg11[%c0_23, %c0_24], %28 {strides = array<i32>} : memref<8x4xf32, #tpu.memory_space<vmem>>, vector<8x4xf32>,
    return
  }
  func.func @transform_0(%arg0: i32) -> (i32, i32) {
    %c0_i32 = arith.constant 0 : i32
    %c0_i32_0 = arith.constant 0 : i32
    return %arg0, %c0_i32 : i32, i32
  }
  func.func @transform_1(%arg0: i32) -> (i32, i32) {
    %c0_i32 = arith.constant 0 : i32
    %c0_i32_0 = arith.constant 0 : i32
    return %arg0, %c0_i32 : i32, i32
  }
  func.func @transform_2(%arg0: i32) -> (i32, i32) {
    %c0_i32 = arith.constant 0 : i32
    %c0_i32_0 = arith.constant 0 : i32
    return %arg0, %c0_i32 : i32, i32
  }
  func.func @transform_3(%arg0: i32) -> (i32, i32) {
    %c0_i32 = arith.constant 0 : i32
    %c0_i32_0 = arith.constant 0 : i32
    %c0_i32_1 = arith.constant 0 : i32
    return %c0_i32, %c0_i32_0 : i32, i32
  }
  func.func @transform_4(%arg0: i32) -> (i32, i32) {
    %c0_i32 = arith.constant 0 : i32
    %c0_i32_0 = arith.constant 0 : i32
    %c0_i32_1 = arith.constant 0 : i32
    return %c0_i32, %c0_i32_0 : i32, i32
  }
  func.func @transform_5(%arg0: i32) -> (i32, i32) {
    %c0_i32 = arith.constant 0 : i32
    %c0_i32_0 = arith.constant 0 : i32
    %c0_i32_1 = arith.constant 0 : i32
    return %c0_i32, %c0_i32_0 : i32, i32
  }
  func.func @transform_6(%arg0: i32) -> (i32, i32) {
    %c0_i32 = arith.constant 0 : i32
    %c0_i32_0 = arith.constant 0 : i32
    %c0_i32_1 = arith.constant 0 : i32
    return %c0_i32, %c0_i32_0 : i32, i32
  }
  func.func @transform_7(%arg0: i32) -> (i32, i32) {
    %c0_i32 = arith.constant 0 : i32
    %c0_i32_0 = arith.constant 0 : i32
    %c0_i32_1 = arith.constant 0 : i32
    return %c0_i32, %c0_i32_0 : i32, i32
  }
  func.func @transform_8(%arg0: i32) -> (i32, i32) {
    %c0_i32 = arith.constant 0 : i32
    %c0_i32_0 = arith.constant 0 : i32
    %c0_i32_1 = arith.constant 0 : i32
    return %c0_i32, %c0_i32_0 : i32, i32
  }
  func.func @transform_9(%arg0: i32) -> (i32, i32) {
    %c0_i32 = arith.constant 0 : i32
    %c0_i32_0 = arith.constant 0 : i32
    %c0_i32_1 = arith.constant 0 : i32
    return %c0_i32, %c0_i32_0 : i32, i32
  }
  func.func @transform_10(%arg0: i32) -> (i32, i32) {
    %c0_i32 = arith.constant 0 : i32
    %c0_i32_0 = arith.constant 0 : i32
    return %arg0, %c0_i32 : i32, i32
  }
}

</mosaic_0001>

<bundles_post_ra>
// kernel: tpu_custom_call.1
= control target key start
LH: loop header
LB: loop body
LE: loop exit
PB: predicated region body
PF: predicated region fallthrough
CT: control target
= control target key end

     0   :  { %15 = vsyncpa [#allocation3], 0  ;;  %s955_s0 = inlined_call_operand.hbm [shape: f32[8,8], index: 0, kind: input, shape index: {}]   ;;  %s956_s1 = inlined_call_operand.hbm [shape: f32[8,8], index: 1, kind: input, shape index: {}]   ;;  %s957_s2 = inlined_call_operand.vmem [shape: f32[8,1], index: 2, kind: input, shape index: {}]   ;;  %s958_s3 = inlined_call_operand.vmem [shape: f32[16,32], index: 3, kind: input, shape index: {}]   ;;  %s959_s4 = inlined_call_operand.hbm [shape: f32[1,32], index: 4, kind: input, shape index: {}]   ;;  %s960_s5 = inlined_call_operand.hbm [shape: f32[1,32], index: 5, kind: input, shape index: {}]   ;;  %s961_s6 = inlined_call_operand.vmem [shape: f32[32,32], index: 6, kind: input, shape index: {}]   ;;  %s962_s7 = inlined_call_operand.hbm [shape: f32[1,32], index: 7, kind: input, shape index: {}]   ;;  %s963_s8 = inlined_call_operand.vmem [shape: f32[32,4], index: 8, kind: input, shape index: {}]   ;;  %s964_s9 = inlined_call_operand.vmem [shape: f32[1,4], index: 9, kind: input, shape index: {}]   ;;  %s965_s10 = inlined_call_operand.vmem [shape: f32[8,4], index: 10, kind: output, shape index: {}]  }
   0x1   :  { %16 = vsyncpa [#allocation5], 0  ;;  %s34_s15 = sshll.u32 %s956_s1, 4  ;;  %s35_s15 = int_to_ptr.hbm [resolvable:$true] %s34_s15 }
   0x2   :  { %17 = vsyncpa [#allocation8], 0  ;;  %s837_s16 = smov [#allocation4]   ;;  %s60_s20 = sshll.u32 %s960_s5, 4  ;;  %s61_s20 = int_to_ptr.hbm [resolvable:$true] %s60_s20 }
   0x3   :  { %s36_s17 = sshll.u32 %s837_s16, 4  ;;  %s838_s21 = smov [#allocation7]   ;;  %s37_s17 = int_to_ptr.vmem [resolvable:$true] %s36_s17 }
   0x4   :  { %39 = dma.hbm_to_vmem [thread:$0]  %s35_s15, 128, %s37_s17, [#allocation5]  }
   0x5   :  { %s62_s22 = sshll.u32 %s838_s21, 4  ;;  %s23_s25 = sshll.u32 %s955_s0, 4  ;;  %s63_s22 = int_to_ptr.vmem [resolvable:$true] %s62_s22  ;;  %s24_s25 = int_to_ptr.hbm [resolvable:$true] %s23_s25 }
   0x6   :  { %65 = dma.hbm_to_vmem [thread:$0]  %s61_s20, 16, %s63_s22, [#allocation8]  }
   0x7   :  { %s49_s27 = sshll.u32 %s959_s4, 4  ;;  %s839_s28 = smov [#allocation2]   ;;  %s50_s27 = int_to_ptr.hbm [resolvable:$true] %s49_s27 }
   0x8   :  { %s25_s29 = sshll.u32 %s839_s28, 4  ;;  %s840_s5 = smov [#allocation6]   ;;  %s26_s29 = int_to_ptr.vmem [resolvable:$true] %s25_s29 }
   0x9   :  { %28 = dma.hbm_to_vmem [thread:$0]  %s24_s25, 128, %s26_s29, [#allocation3]  }
   0xa   :  { %s51_s30 = sshll.u32 %s840_s5, 4  ;;  %s73_s13 = sshll.u32 %s962_s7, 4  ;;  %s52_s30 = int_to_ptr.vmem [resolvable:$true] %s51_s30  ;;  %s74_s13 = int_to_ptr.hbm [resolvable:$true] %s73_s13 }
   0xb   :  { %54 = dma.hbm_to_vmem [thread:$0]  %s50_s27, 16, %s52_s30, [#allocation5]  }
   0xc   :  { %s841_s0 = smov [#allocation9]  }
   0xd   :  { %s75_s14 = sshll.u32 %s841_s0, 4  ;;  %s76_s14 = int_to_ptr.vmem [resolvable:$true] %s75_s14 }
   0xe   :  { %78 = dma.hbm_to_vmem [thread:$0]  %s74_s13, 16, %s76_s14, [#allocation8]  }
   0xf   :  { %831 = dma.done.wait [#allocation3], 128  }
  0x10   :  { %832 = vsyncadd [#allocation3], 4294967168 }
  0x11   :  { %833 = dma.done.wait [#allocation5], 144  }
  0x12   :  { %834 = vsyncadd [#allocation5], 4294967152 }
  0x13   :  { %835 = dma.done.wait [#allocation8], 32  }
  0x14   :  { %836 = vsyncadd [#allocation8], 4294967264  ;;  %v104_v0 = vld [vmem:[#allocation4] sm:$0xff]  ;;  %s842_s4 = smov 8   ;;  %v111_v3 = vld [vmem:[%s958_s3] sm:$0xff]  ;;  %v843_v13 = vmov 0  }
  0x15   :  { %106 = vrot.lane.b32.xlu0 %v104_v0, %s842_s4  ;;  %v112_v1 = vld [vmem:[%s958_s3 + $0x8] sm:$0xff]  ;;  %v144_v5 = vand.u32 4294901760, %v111_v3  ;;  %v113_v14 = vld [vmem:[%s957_s2] sm:$0xff]  ;;  %vm109_vm0 = vcmask 64512   ;;  %vm124_vm1 = vcmask 130048   ;;  %v296_v24 = vld [vmem:[%s961_s6 + $0x18] sm:$0xff] }
  0x16   :  { %v142_v2 = vand.u32 4294901760, %v112_v1  ;;  %704 = vset.pattern.permute.xlu0 %v843_v13  ;;  %v103_v15 = vld [vmem:[#allocation2] sm:$0xff]  ;;  %v317_v25 = vand.u32 4294901760, %v296_v24  ;;  %v295_v26 = vld [vmem:[%s961_s6 + $0x10] sm:$0xff]  ;;  %v294_v29 = vld [vmem:[%s961_s6 + $0x8] sm:$0xff]  ;;  %vm301_vm2 = vcmask 261120  }
  0x17   :  { %v176_v7 = vsub.f32 %v111_v3, %v144_v5  ;;  %v319_v28 = vand.u32 4294901760, %v295_v26  ;;  %v321_v32 = vand.u32 4294901760, %v294_v29  ;;  %v293_v33 = vld [vmem:[%s961_s6] sm:$0xff]  ;;  %v705_v48 = vld [vmem:[#allocation6] ss:$0 sm:$0xff]  ;;  %v492_v13 = vld [vmem:[%s963_s8 + $0x8] sm:$0xff] }
  0x18   :  { %v170_v4 = vsub.f32 %v112_v1, %v142_v2  ;;  %227 = vmatpush.msra.mxu3 %v142_v2  ;;  %143 = vmatpush.msra.mxu0 %v142_v2  ;;  %v347_v27 = vsub.f32 %v296_v24, %v317_v25  ;;  %v323_v37 = vand.u32 4294901760, %v293_v33  ;;  %v706_v61 = vld [vmem:[#allocation7] ss:$0 sm:$0xff]  ;;  %vm688_vm3 = vcmask 31744  }
  0x19   :  { %v177_v9 = vand.u32 4294901760, %v176_v7  ;;  %v353_v31 = vsub.f32 %v295_v26, %v319_v28  ;;  %v359_v36 = vsub.f32 %v294_v29, %v321_v32 }
  0x1a   :  { %v171_v6 = vand.u32 4294901760, %v170_v4  ;;  %202 = vmatpush.msra.mxu2 %v170_v4  ;;  %229 = vmatpush.msra.mxu3 %v144_v5  ;;  %v348_v30 = vand.u32 4294901760, %v347_v27  ;;  %v365_v41 = vsub.f32 %v293_v33, %v323_v37 }
  0x1b   :  { %145 = vmatpush.msra.mxu0 %v144_v5  ;;  %v178_v11 = vsub.f32 %v176_v7, %v177_v9  ;;  %v354_v35 = vand.u32 4294901760, %v353_v31  ;;  %v360_v40 = vand.u32 4294901760, %v359_v36 }
  0x1c   :  { %v172_v8 = vsub.f32 %v170_v4, %v171_v6  ;;  %205 = vmatpush.msra.mxu2 %v176_v7  ;;  %v349_v34 = vsub.f32 %v347_v27, %v348_v30  ;;  %v366_v44 = vand.u32 4294901760, %v365_v41 }
  0x1d   :  { %254 = vmatpush.msrb.mxu0 %v171_v6  ;;  %v179_v12 = vand.u32 4294901760, %v178_v11  ;;  %117 = vperm.xlu0 %704, %v113_v14   ;;  %v355_v39 = vsub.f32 %v353_v31, %v354_v35  ;;  %v361_v43 = vsub.f32 %v359_v36, %v360_v40 }
  0x1e   :  { %v173_v10 = vand.u32 4294901760, %v172_v8  ;;  %318 = vmatpush.msrb.mxu2 %v317_v25  ;;  %v350_v38 = vand.u32 4294901760, %v349_v34  ;;  %v367_v46 = vsub.f32 %v365_v41, %v366_v44  ;;  %v494_v8 = vld [vmem:[%s963_s8 + $0x18] sm:$0xff] }
  0x1f   :  { %258 = vmatpush.msrb.mxu0 %v177_v9  ;;  %v356_v42 = vand.u32 4294901760, %v355_v39  ;;  %v362_v45 = vand.u32 4294901760, %v361_v43  ;;  %v514_v9 = vand.u32 4294901760, %v494_v8 }
  0x20   :  { %174 = vmatpush.msra.mxu1 %v173_v10  ;;  %320 = vmatpush.msrb.mxu2 %v319_v28  ;;  %v368_v47 = vand.u32 4294901760, %v367_v46  ;;  %v493_v10 = vld [vmem:[%s963_s8 + $0x10] sm:$0xff] }
  0x21   :  { %351 = vmatpush.msrb.mxu3 %v350_v38  ;;  %v544_v11 = vsub.f32 %v494_v8, %v514_v9 }
  0x22   :  { %180 = vmatpush.msra.mxu1 %v179_v12  ;;  %322 = vmatpush.msrb.mxu2 %v321_v32  ;;  %v516_v12 = vand.u32 4294901760, %v493_v10 }
  0x23   :  { %357 = vmatpush.msrb.mxu3 %v356_v42  ;;  %v545_v14 = vand.u32 4294901760, %v544_v11 }
  0x24   :  { %279 = vmatpush.msrb.mxu1 %v142_v2  ;;  %324 = vmatpush.msrb.mxu2 %v323_v37 }
  0x25   :  { %363 = vmatpush.msrb.mxu3 %v362_v45 }
  0x26   :  { %281 = vmatpush.msrb.mxu1 %v144_v5 }
  0x27   :  { %369 = vmatpush.msrb.mxu3 %v368_v47 }
  0x87   :  { %v107_v16 = vpop.permute.xlu0 %106 }
  0x88   :  { %v110_v17 = vsel %vm109_vm0, %v103_v15, %v107_v16  ;;  %v550_v15 = vsub.f32 %v493_v10, %v516_v12  ;;  %v518_v16 = vand.u32 4294901760, %v492_v13 }
  0x89   :  { %v126_v18 = vsel %vm124_vm1, %v110_v17, 0  ;;  %v491_v17 = vld [vmem:[%s963_s8] sm:$0xff] }
  0x8a   :  { %v146_v19 = vand.u32 4294901760, %v126_v18 }
  0x8c   :  { %v147_v20 = vsub.f32 %v126_v18, %v146_v19  ;;  %182 = vmatmul.f32.vlgmr.msra.gmra.mxu1 %v146_v19  ;;  %v546_v18 = vsub.f32 %v544_v11, %v545_v14 }
  0x8d   :  { %418 = vmatpush.msra.mxu1 %v317_v25 }
  0x8e   :  { %208 = vmatmul.f32.vlgmr.msra.gmra.mxu2 %v147_v20  ;;  %v148_v21 = vand.u32 4294901760, %v147_v20 }
  0x8f   :  { %420 = vmatpush.msra.mxu1 %v319_v28  ;;  %447 = vmatpush.msra.mxu2 %v348_v30  ;;  %v118_v49 = vpop.permute.xlu0 %117 }
  0x90   :  { %233 = vmatmul.f32.vlgmr.msra.gmra.mxu3 %v148_v21  ;;  %v149_v22 = vsub.f32 %v147_v20, %v148_v21  ;;  %v123_v50 = vmul.f32 %v705_v48, %v118_v49  ;;  %v556_v20 = vsub.f32 %v492_v13, %v518_v16  ;;  %v520_v21 = vand.u32 4294901760, %v491_v17 }
  0x91   :  { %422 = vmatpush.msra.mxu1 %v321_v32  ;;  %451 = vmatpush.msra.mxu2 %v354_v35 }
  0x92   :  { %v150_v23 = vand.u32 4294901760, %v149_v22  ;;  %478 = vmatpush.msra.mxu3 %v317_v25  ;;  %v547_v22 = vand.u32 4294901760, %v546_v18  ;;  %v557_v24 = vand.u32 4294901760, %v556_v20  ;;  %v562_v25 = vsub.f32 %v491_v17, %v520_v21 }
  0x93   :  { %424 = vmatpush.msra.mxu1 %v323_v37  ;;  %455 = vmatpush.msra.mxu2 %v360_v40 }
  0x94   :  { %151 = vmatmul.f32.vlgmr.msra.gmra.mxu0 %v150_v23  ;;  %283 = vmatmul.f32.vlgmr.msrb.gmra.mxu1 %v146_v19 }
  0x95   :  { %389 = vmatpush.msra.mxu0 %v347_v27  ;;  %459 = vmatpush.msra.mxu2 %v366_v44  ;;  %v558_v27 = vsub.f32 %v556_v20, %v557_v24 }
  0x96   :  { %480 = vmatpush.msra.mxu3 %v319_v28  ;;  %548 = vmatpush.msrb.mxu1 %v547_v22  ;;  %v563_v28 = vand.u32 4294901760, %v562_v25 }
  0x97   :  { %392 = vmatpush.msra.mxu0 %v353_v31  ;;  %v559_v29 = vand.u32 4294901760, %v558_v27 }
  0x98   :  { %482 = vmatpush.msra.mxu3 %v321_v32  ;;  %v564_v30 = vsub.f32 %v562_v25, %v563_v28  ;;  %v707_v32 = vld [vmem:[#allocation9] ss:$0 sm:$0xff] }
  0x99   :  { %395 = vmatpush.msra.mxu0 %v359_v36 }
  0x9a   :  { %484 = vmatpush.msra.mxu3 %v323_v37  ;;  %v565_v31 = vand.u32 4294901760, %v564_v30 }
  0x9b   :  { %398 = vmatpush.msra.mxu0 %v365_v41 }
  0x9c   :  { %260 = vmatmul.f32.vlgmr.msrb.gmra.mxu0 %v146_v19  ;;  %v551_v19 = vand.u32 4294901760, %v550_v15 }
  0x9d   :  { %515 = vmatpush.msrb.mxu0 %v514_v9 }
  0x9e   :  { %v552_v23 = vsub.f32 %v550_v15, %v551_v19 }
  0x9f   :  { %517 = vmatpush.msrb.mxu0 %v516_v12 }
  0xa0   :  { %v553_v26 = vand.u32 4294901760, %v552_v23 }
  0xa1   :  { %519 = vmatpush.msrb.mxu0 %v518_v16 }
  0xa2   :  { %554 = vmatpush.msrb.mxu1 %v553_v26 }
  0xa3   :  { %521 = vmatpush.msrb.mxu0 %v520_v21 }
  0xa4   :  { %560 = vmatpush.msrb.mxu1 %v559_v29 }
  0xa6   :  { %566 = vmatpush.msrb.mxu1 %v565_v31 }
 0x109   :  { %v183_v51 = vpop.f32.mrf.mxu1 }
 0x111   :  { %v152_v52 = vpop.f32.mrf.mxu0  ;;  %v209_v55 = vpop.f32.mrf.mxu2 }
 0x112   :  { %v153_v53 = vadd.f32 %v152_v52, %v123_v50  ;;  %v284_v62 = vpop.f32.mrf.mxu1  ;;  %v708_v52 = vld [vmem:[%s964_s9] ss:$0 sm:$0xff] }
 0x113   :  { %v234_v57 = vpop.f32.mrf.mxu3 }
 0x114   :  { %v184_v54 = vadd.f32 %v183_v51, %v153_v53 }
 0x116   :  { %v210_v56 = vadd.f32 %v209_v55, %v184_v54 }
 0x118   :  { %v235_v58 = vadd.f32 %v234_v57, %v210_v56 }
 0x119   :  { %v261_v59 = vpop.f32.mrf.mxu0 }
 0x11a   :  { %v262_v60 = vadd.f32 %v261_v59, %v235_v58 }
 0x11c   :  { %v285_v63 = vadd.f32 %v284_v62, %v262_v60 }
 0x11e   :  { %v291_v0 = vadd.f32 %v706_v61, %v285_v63 }
 0x120   :  { %v292_v1 = vmax.f32 %v291_v0, 0.0 }
 0x122   :  { %v303_v2 = vsel %vm301_vm2, %v292_v1, 0 }
 0x123   :  { %v325_v3 = vand.u32 4294901760, %v303_v2 }
 0x125   :  { %371 = vmatmul.f32.vlgmr.msrb.gmra.mxu3 %v325_v3  ;;  %v326_v4 = vsub.f32 %v303_v2, %v325_v3 }
 0x126   :  { %615 = vmatpush.msrb.mxu3 %v514_v9 }
 0x127   :  { %401 = vmatmul.f32.vlgmr.msra.gmra.mxu0 %v326_v4  ;;  %v327_v5 = vand.u32 4294901760, %v326_v4 }
 0x128   :  { %617 = vmatpush.msrb.mxu3 %v516_v12  ;;  %644 = vmatpush.msra.mxu0 %v545_v14 }
 0x129   :  { %428 = vmatmul.f32.vlgmr.msra.gmra.mxu1 %v327_v5  ;;  %v328_v6 = vsub.f32 %v326_v4, %v327_v5 }
 0x12a   :  { %619 = vmatpush.msrb.mxu3 %v518_v16  ;;  %648 = vmatpush.msra.mxu0 %v551_v19 }
 0x12b   :  { %v329_v7 = vand.u32 4294901760, %v328_v6  ;;  %675 = vmatpush.msra.mxu1 %v514_v9 }
 0x12c   :  { %621 = vmatpush.msrb.mxu3 %v520_v21  ;;  %652 = vmatpush.msra.mxu0 %v557_v24 }
 0x12d   :  { %330 = vmatmul.f32.vlgmr.msrb.gmra.mxu2 %v329_v7  ;;  %486 = vmatmul.f32.vlgmr.msra.gmra.mxu3 %v325_v3 }
 0x12e   :  { %586 = vmatpush.msrb.mxu2 %v544_v11  ;;  %656 = vmatpush.msra.mxu0 %v563_v28 }
 0x12f   :  { %677 = vmatpush.msra.mxu1 %v516_v12 }
 0x130   :  { %589 = vmatpush.msrb.mxu2 %v550_v15 }
 0x131   :  { %679 = vmatpush.msra.mxu1 %v518_v16 }
 0x132   :  { %592 = vmatpush.msrb.mxu2 %v556_v20 }
 0x133   :  { %681 = vmatpush.msra.mxu1 %v520_v21 }
 0x134   :  { %595 = vmatpush.msrb.mxu2 %v562_v25 }
 0x135   :  { %461 = vmatmul.f32.vlgmr.msra.gmra.mxu2 %v325_v3 }
 0x1a4   :  { %v402_v37 = vpop.f32.mrf.mxu0 }
 0x1a6   :  { %v429_v39 = vpop.f32.mrf.mxu1 }
 0x1a8   :  { %v372_v33 = vpop.f32.mrf.mxu3 }
 0x1b0   :  { %v331_v34 = vpop.f32.mrf.mxu2  ;;  %v487_v43 = vpop.f32.mrf.mxu3 }
 0x1b1   :  { %v332_v35 = vadd.f32 %v707_v32, %v331_v34 }
 0x1b3   :  { %v373_v36 = vadd.f32 %v372_v33, %v332_v35 }
 0x1b5   :  { %v403_v38 = vadd.f32 %v402_v37, %v373_v36 }
 0x1b7   :  { %v430_v40 = vadd.f32 %v429_v39, %v403_v38 }
 0x1b8   :  { %v462_v41 = vpop.f32.mrf.mxu2 }
 0x1b9   :  { %v463_v42 = vadd.f32 %v462_v41, %v430_v40 }
 0x1bb   :  { %v488_v44 = vadd.f32 %v487_v43, %v463_v42 }
 0x1bd   :  { %v490_v45 = vmax.f32 %v488_v44, 0.0 }
 0x1bf   :  { %v500_v46 = vsel %vm301_vm2, %v490_v45, 0 }
 0x1c0   :  { %v522_v47 = vand.u32 4294901760, %v500_v46 }
 0x1c2   :  { %v523_v48 = vsub.f32 %v500_v46, %v522_v47  ;;  %568 = vmatmul.f32.vlgmr.msrb.gmra.mxu1 %v522_v47 }
 0x1c4   :  { %598 = vmatmul.f32.vlgmr.msrb.gmra.mxu2 %v523_v48  ;;  %v524_v49 = vand.u32 4294901760, %v523_v48 }
 0x1c6   :  { %625 = vmatmul.f32.vlgmr.msrb.gmra.mxu3 %v524_v49  ;;  %v525_v50 = vsub.f32 %v523_v48, %v524_v49 }
 0x1c8   :  { %v526_v51 = vand.u32 4294901760, %v525_v50 }
 0x1ca   :  { %527 = vmatmul.f32.vlgmr.msrb.gmra.mxu0 %v526_v51  ;;  %683 = vmatmul.f32.vlgmr.msra.gmra.mxu1 %v522_v47 }
 0x1d2   :  { %658 = vmatmul.f32.vlgmr.msra.gmra.mxu0 %v522_v47 }
 0x23f   :  { %v569_v53 = vpop.f32.mrf.mxu1 }
 0x247   :  { %v528_v54 = vpop.f32.mrf.mxu0  ;;  %v599_v57 = vpop.f32.mrf.mxu2 }
 0x248   :  { %v529_v55 = vadd.f32 %v708_v52, %v528_v54  ;;  %v684_v63 = vpop.f32.mrf.mxu1 }
 0x249   :  { %v626_v59 = vpop.f32.mrf.mxu3 }
 0x24a   :  { %v570_v56 = vadd.f32 %v569_v53, %v529_v55 }
 0x24c   :  { %v600_v58 = vadd.f32 %v599_v57, %v570_v56 }
 0x24e   :  { %v627_v60 = vadd.f32 %v626_v59, %v600_v58 }
 0x24f   :  { %v659_v61 = vpop.f32.mrf.mxu0 }
 0x250   :  { %v660_v62 = vadd.f32 %v659_v61, %v627_v60 }
 0x252   :  { %v685_v0 = vadd.f32 %v684_v63, %v660_v62 }
 0x254   :  { %709 = vtanh.f32 %v685_v0 }
 0x25a   :  { %v710_v1 = vpop.eup %709 }
 0x25b   :  { %689 = vst.msk [vmem:[%s965_s10] sm:$0xff] %vm688_vm3, %v710_v1 }
 0x25c   :  { %694 = vsyncpa [#allocation3], 1 }
 0x25d   :  { %695 = vsyncpa [#allocation5], 1 }
 0x25e   :  { %696 = vsyncpa [#allocation8], 1 }

</bundles_post_ra>
